<compile_context>
chip_gen: v7x
topology: tpu7x:2x2x1
jax: 0.10.0
libtpu: 0.0.40
codegen_flags: <defaults>
</compile_context>

<pallas_src>
import jax
import jax.numpy as jnp
from jax.experimental import pallas as pl
from jax.experimental.pallas import tpu as pltpu


_NEG_BIG = -1e30   # large negative *finite* bias for padded vocab columns (never -inf -> never NaN)


def _round_up(x, m):
    return (x + m - 1) // m * m


def _choose_tiling(v, h, b_pad):
    """Generation-aware vocab tile + explicit VMEM limit.

    Returns (tv, v_pad, nv, vmem_limit_bytes). tv is a multiple of 128; the
    double-buffered bf16 W tile pair is budgeted per-chip-generation."""
    try:
        info = pltpu.get_tpu_info()
        vmem_cap = int(getattr(info, "vmem_capacity_bytes", 0)) or 64 * 1024 * 1024
    except Exception:  # pragma: no cover - conservative (v7x-safe) fallback
        vmem_cap = 64 * 1024 * 1024

    big_vmem = vmem_cap >= 100 * 1024 * 1024          # v5e / v6e: 128 MiB per TC
    w_budget = (28 if big_vmem else 12) * 1024 * 1024  # v7x (64 MiB): keep W pair small

    # Largest lane-aligned tile whose double-buffered bf16 W pair fits the budget.
    cap = max(128, (w_budget // (2 * 2 * h)) // 128 * 128)
    tv = min(cap, 2048)
    tv = max(tv, 512)                       # keep strided W-row DMA runs >= 1 KiB
    tv = min(tv, _round_up(v, 128))         # never exceed the (128-padded) vocab
    v_pad = _round_up(v, tv)
    nv = v_pad // tv

    # Explicit VMEM accounting (+ slack), capped at ~3/4 of physical capacity
    # (~48 MiB on v7x, ~96 MiB on v5e/v6e).
    vmem_bytes = (2 * h * tv * 2              # W tile double buffer (bf16)
                  + 2 * nv * 8 * tv * 4       # resident bias [nv,1,tv] (sublane-padded, x2 headroom)
                  + 2 * b_pad * tv * 4        # logits tile double buffer (f32)
                  + nv * b_pad * tv * 4       # resident [nv,B,tv] logprobs (f32)
                  + 2 * b_pad * h * 2         # resident hidden (x2 headroom)
                  + 4 * 1024 * 1024)          # compiler-internal scratch slack
    ceiling = int(vmem_cap * 3 // 4)
    vmem_limit = int(min(max(vmem_bytes, 32 * 1024 * 1024), ceiling))
    return tv, v_pad, nv, vmem_limit


def _lm_head_logsoftmax_kernel(h_ref, w_ref, b_ref, logits_ref, logprobs_ref,
                               m_sc, l_sc):
    """One vocab tile per grid step.

    h_ref       : [B, H]       bf16  (resident across the grid)
    w_ref       : [H, TV]      bf16  (per-tile, double-buffered)
    b_ref       : [NV, 1, TV]  f32   (resident; one DMA total)
    logits_ref  : [B, TV]      f32 out (per-tile, streamed)
    logprobs_ref: [NV, B, TV]  f32 out (VMEM-resident; finalized in place)
    m_sc, l_sc  : [B, 1]       f32 scratch (running max / running sum-exp)
    """
    j = pl.program_id(0)
    nv = pl.num_programs(0)

    @pl.when(j == 0)
    def _init():
        m_sc[...] = jnp.full_like(m_sc, -jnp.inf)
        l_sc[...] = jnp.zeros_like(l_sc)

    # MXU matmul: bf16 inputs, f32 accumulation; bias added in f32.
    logits = jnp.dot(h_ref[...], w_ref[...],
                     preferred_element_type=jnp.float32) + b_ref[j]

    # Online (running) max / sum-exp over the tiled vocab axis (all f32).
    # NaN-safety: padded bias columns are a large *finite* negative, so m_new is
    # always finite and exp(m_old - m_new) at j==0 is exp(-inf) == 0 with l == 0.
    tile_max = jnp.max(logits, axis=-1, keepdims=True)
    m_new = jnp.maximum(m_sc[...], tile_max)
    l_sc[...] = (l_sc[...] * jnp.exp(m_sc[...] - m_new)
                 + jnp.sum(jnp.exp(logits - m_new), axis=-1, keepdims=True))
    m_sc[...] = m_new

    logits_ref[...] = logits       # per-tile logits output (streamed to HBM)
    logprobs_ref[j] = logits       # stash raw logits directly in the resident output

    @pl.when(j == nv - 1)
    def _finalize():
        lse = m_sc[...] + jnp.log(l_sc[...])              # [B, 1] global log-sum-exp
        # Single in-place subtraction; (B,1) broadcasts over (NV,B,TV).
        logprobs_ref[...] = logprobs_ref[...] - lse


def lm_head_logsoftmax(h_last, w_lm, b_lm):
    """Pallas call wrapper. h_last: [B, H] bf16, w_lm: [H, V] bf16, b_lm: [1, V] f32."""
    B, H = h_last.shape
    V = w_lm.shape[1]

    b_pad = _round_up(max(B, 8), 8)                 # sublane-align batch (free: B<8 already pads to 8)
    tv, v_pad, nv, vmem_limit = _choose_tiling(V, H, b_pad)

    h = h_last
    if b_pad != B:
        h = jnp.pad(h, ((0, b_pad - B), (0, 0)))
    w = w_lm
    b = b_lm
    if v_pad != V:
        w = jnp.pad(w, ((0, 0), (0, v_pad - V)))
        # Large negative *finite* pad so padded columns never win the running max
        # and contribute exp(~-huge) == 0 to the sum (never NaN).
        b = jnp.pad(b, ((0, 0), (0, v_pad - V)), constant_values=_NEG_BIG)
    b3 = b.reshape(nv, 1, tv)                       # resident bias, leading-axis indexed in-kernel

    logits_p, logprobs3 = pl.pallas_call(
        _lm_head_logsoftmax_kernel,
        out_shape=(
            jax.ShapeDtypeStruct((b_pad, v_pad), jnp.float32),   # logits
            jax.ShapeDtypeStruct((nv, b_pad, tv), jnp.float32),  # logprobs (tile-major)
        ),
        grid_spec=pltpu.PrefetchScalarGridSpec(
            num_scalar_prefetch=0,
            grid=(nv,),
            in_specs=[
                pl.BlockSpec((b_pad, H), lambda j: (0, 0)),      # hidden: resident
                pl.BlockSpec((H, tv), lambda j: (0, j)),         # W tile: pipelined (double-buffered)
                pl.BlockSpec((nv, 1, tv), lambda j: (0, 0, 0)),  # bias: resident (single DMA)
            ],
            out_specs=[
                pl.BlockSpec((b_pad, tv), lambda j: (0, j)),         # logits tile (streamed)
                pl.BlockSpec((nv, b_pad, tv), lambda j: (0, 0, 0)),  # logprobs: VMEM-resident
            ],
            scratch_shapes=[
                pltpu.VMEM((b_pad, 1), jnp.float32),             # running max
                pltpu.VMEM((b_pad, 1), jnp.float32),             # running sum-exp
            ],
        ),
        compiler_params=pltpu.CompilerParams(
            dimension_semantics=("arbitrary",),                  # vocab axis carries reduction state
            vmem_limit_bytes=vmem_limit,
        ),
    )(h, w, b3)

    logits = logits_p[:B, :V]
    # Tile-major -> vocab-major; layout plumbing outside the kernel (tiny vs. the W stream).
    logprobs = jnp.transpose(logprobs3, (1, 0, 2)).reshape(b_pad, v_pad)[:B, :V]
    return logits, logprobs


def model_wrapper_forward(params, input_ids, attention_mask):
    """JAX equivalent of ModelWrapper.forward (inference, no_grad semantics).

    Returns dict with 'logits' ([B, V], last position) and 'logprobs'
    (= log_softmax(logits, dim=-1)), matching _unify_model_output.
    """
    del attention_mask  # synthetic single-layer LM: mask does not alter the last-token hidden
    emb = params["embedding"]          # [Vocab, H] f32
    w_lm = params["lm_head_w"]         # [H, Vocab] bf16
    b_lm = params["lm_head_b"]         # [1, Vocab] f32

    # Gather ONLY the last token's embedding (logits[:, -1, :] semantics) —
    # avoids materializing and slicing a full [B, S, H] hidden state.
    hidden_last = jnp.take(emb, input_ids[:, -1], axis=0).astype(jnp.bfloat16)  # [B, H]

    logits, logprobs = lm_head_logsoftmax(hidden_last, w_lm, b_lm)
    # TODO(synk): past_key_values / hidden_states caching of the wrapped HF
    # model has no standalone Pallas equivalent in this synthetic model.
    return {"logits": logits, "logprobs": logprobs}


def init_params(key, vocab_size, hidden_size):
    k1, k2, k3 = jax.random.split(key, 3)
    embedding = jax.random.normal(k1, (vocab_size, hidden_size), jnp.float32) * 0.02
    lm_head_w = (jax.random.normal(k2, (hidden_size, vocab_size), jnp.float32) * 0.02
                 ).astype(jnp.bfloat16)   # kernel is W-DMA bound -> store head weights in bf16
    lm_head_b = jax.random.normal(k3, (1, vocab_size), jnp.float32) * 0.01
    return {"embedding": embedding, "lm_head_w": lm_head_w, "lm_head_b": lm_head_b}


if __name__ == "__main__":
    # batch=2, seq=8, hidden=32.  vocab=4100 (NOT a multiple of 128) exercises
    # vocab padding and the multi-tile online-softmax path (nv >= 2).
    B, S, H, V = 2, 8, 32, 4100

    key = jax.random.PRNGKey(0)
    kp, ki = jax.random.split(key)
    params = init_params(kp, V, H)

    input_ids = jax.random.randint(ki, (B, S), 0, V, dtype=jnp.int32)
    attention_mask = jnp.ones((B, S), dtype=jnp.int32)

    out = model_wrapper_forward(params, input_ids, attention_mask)
    logits = jax.block_until_ready(out["logits"])
    logprobs = jax.block_until_ready(out["logprobs"])

    # Reference check against plain JAX (same bf16 inputs, f32 math).
    h_ref = jnp.take(params["embedding"], input_ids[:, -1], axis=0).astype(jnp.bfloat16)
    ref_logits = (h_ref.astype(jnp.float32) @ params["lm_head_w"].astype(jnp.float32)
                  + params["lm_head_b"])
    ref_logprobs = jax.nn.log_softmax(ref_logits, axis=-1)

    assert logits.shape == (B, V) and logprobs.shape == (B, V)
    assert jnp.allclose(logits, ref_logits, atol=2e-4, rtol=2e-4), \
        float(jnp.max(jnp.abs(logits - ref_logits)))
    assert jnp.allclose(logprobs, ref_logprobs, atol=2e-4, rtol=2e-4), \
        float(jnp.max(jnp.abs(logprobs - ref_logprobs)))

    print("KERNEL_OK")
</pallas_src>

<mosaic_0001>
module attributes {stable_mosaic.version = 11 : i64} {
  func.func @_lm_head_logsoftmax_kernel(%arg0: i32, %arg1: memref<8x32xbf16, #tpu.memory_space<vmem>>, %arg2: memref<32x2048xbf16, #tpu.memory_space<vmem>>, %arg3: memref<3x1x2048xf32, #tpu.memory_space<vmem>>, %arg4: memref<8x2048xf32, #tpu.memory_space<vmem>>, %arg5: memref<3x8x2048xf32, #tpu.memory_space<vmem>>, %arg6: memref<8x1xf32, #tpu.memory_space<vmem>>, %arg7: memref<8x1xf32, #tpu.memory_space<vmem>>) attributes {dimension_semantics = [#tpu.dimension_semantics<arbitrary>], iteration_bounds = array<i64: 3>, scalar_prefetch = 0 : i64, scratch_operands = 2 : i64, tpu.core_type = #tpu.core_type<tc>, window_params = [{pipeline_mode = #tpu.pipeline_mode<synchronous>, transform_indices = @transform_0, window_bounds = array<i64: 8, 32>}, {transform_indices = @transform_1, window_bounds = array<i64: 32, 2048>}, {pipeline_mode = #tpu.pipeline_mode<synchronous>, transform_indices = @transform_2, window_bounds = array<i64: 3, 1, 2048>}, {transform_indices = @transform_3, window_bounds = array<i64: 8, 2048>}, {pipeline_mode = #tpu.pipeline_mode<synchronous>, transform_indices = @transform_4, window_bounds = array<i64: 3, 8, 2048>}]} {
    %c0_i32 = arith.constant 0 : i32
    %0 = arith.cmpi eq, %arg0, %c0_i32 : i32
    %1 = arith.extui %0 : i1 to i32
    %c0_i32_0 = arith.constant 0 : i32
    %2 = arith.cmpi ne, %1, %c0_i32_0 : i32
    scf.if %2 {
      %cst_23 = arith.constant 0xFF800000 : f32
      %36 = vector.broadcast %cst_23 : f32 to vector<8x1xf32>
      %c0_24 = arith.constant 0 : index
      %c0_25 = arith.constant 0 : index
      %37 = vector.load %arg6[%c0_24, %c0_25] : memref<8x1xf32, #tpu.memory_space<vmem>>, vector<8x1xf32>
      tpu.vector_store %arg6[%c0_24, %c0_25], %36 {strides = array<i32>} : memref<8x1xf32, #tpu.memory_space<vmem>>, vector<8x1xf32>,
      %cst_26 = arith.constant 0.000000e+00 : f32
      %38 = vector.broadcast %cst_26 : f32 to vector<8x1xf32>
      %c0_27 = arith.constant 0 : index
      %c0_28 = arith.constant 0 : index
      %39 = vector.load %arg7[%c0_27, %c0_28] : memref<8x1xf32, #tpu.memory_space<vmem>>, vector<8x1xf32>
      tpu.vector_store %arg7[%c0_27, %c0_28], %38 {strides = array<i32>} : memref<8x1xf32, #tpu.memory_space<vmem>>, vector<8x1xf32>,
    } else {
    }
    %c0 = arith.constant 0 : index
    %c0_1 = arith.constant 0 : index
    %3 = vector.load %arg1[%c0, %c0_1] : memref<8x32xbf16, #tpu.memory_space<vmem>>, vector<8x32xbf16>
    %c0_2 = arith.constant 0 : index
    %c0_3 = arith.constant 0 : index
    %4 = vector.load %arg2[%c0_2, %c0_3] : memref<32x2048xbf16, #tpu.memory_space<vmem>>, vector<32x2048xbf16>
    %cst = arith.constant dense<0.000000e+00> : vector<8x2048xf32>
    %5 = tpu.matmul %3, %4, %cst {dimension_numbers = #tpu.dot_dimension_numbers<[1], [0], [0], [1], [0, 0, 1, 1], [], []>} : vector<8x32xbf16>, vector<32x2048xbf16>, vector<8x2048xf32> -> vector<8x2048xf32>
    %6 = arith.index_cast %arg0 : i32 to index
    %c0_4 = arith.constant 0 : index
    %c0_5 = arith.constant 0 : index
    %7 = vector.load %arg3[%6, %c0_4, %c0_5] : memref<3x1x2048xf32, #tpu.memory_space<vmem>>, vector<1x1x2048xf32>
    %8 = vector.shape_cast %7 : vector<1x1x2048xf32> to vector<1x2048xf32>
    %9 = vector.broadcast %8 : vector<1x2048xf32> to vector<8x2048xf32>
    %10 = arith.addf %5, %9 : vector<8x2048xf32>
    %cst_6 = arith.constant dense<0xFF800000> : vector<8xf32>
    %11 = vector.multi_reduction <maximumf>, %10, %cst_6 [1] : vector<8x2048xf32> to vector<8xf32>
    %12 = vector.shape_cast %11 : vector<8xf32> to vector<8x1xf32>
    %c0_7 = arith.constant 0 : index
    %c0_8 = arith.constant 0 : index
    %13 = vector.load %arg6[%c0_7, %c0_8] : memref<8x1xf32, #tpu.memory_space<vmem>>, vector<8x1xf32>
    %14 = arith.maximumf %13, %12 : vector<8x1xf32>
    %c0_9 = arith.constant 0 : index
    %c0_10 = arith.constant 0 : index
    %15 = vector.load %arg7[%c0_9, %c0_10] : memref<8x1xf32, #tpu.memory_space<vmem>>, vector<8x1xf32>
    %c0_11 = arith.constant 0 : index
    %c0_12 = arith.constant 0 : index
    %16 = vector.load %arg6[%c0_11, %c0_12] : memref<8x1xf32, #tpu.memory_space<vmem>>, vector<8x1xf32>
    %17 = arith.subf %16, %14 : vector<8x1xf32>
    %18 = math.exp %17 : vector<8x1xf32>
    %19 = arith.mulf %15, %18 : vector<8x1xf32>
    %20 = vector.broadcast %14 : vector<8x1xf32> to vector<8x2048xf32>
    %21 = arith.subf %10, %20 : vector<8x2048xf32>
    %22 = math.exp %21 : vector<8x2048xf32>
    %cst_13 = arith.constant dense<0.000000e+00> : vector<8xf32>
    %23 = vector.multi_reduction <add>, %22, %cst_13 [1] : vector<8x2048xf32> to vector<8xf32>
    %24 = vector.shape_cast %23 : vector<8xf32> to vector<8x1xf32>
    %25 = arith.addf %19, %24 : vector<8x1xf32>
    %c0_14 = arith.constant 0 : index
    %c0_15 = arith.constant 0 : index
    %26 = vector.load %arg7[%c0_14, %c0_15] : memref<8x1xf32, #tpu.memory_space<vmem>>, vector<8x1xf32>
    tpu.vector_store %arg7[%c0_14, %c0_15], %25 {strides = array<i32>} : memref<8x1xf32, #tpu.memory_space<vmem>>, vector<8x1xf32>,
    %c0_16 = arith.constant 0 : index
    %c0_17 = arith.constant 0 : index
    %27 = vector.load %arg6[%c0_16, %c0_17] : memref<8x1xf32, #tpu.memory_space<vmem>>, vector<8x1xf32>
    tpu.vector_store %arg6[%c0_16, %c0_17], %14 {strides = array<i32>} : memref<8x1xf32, #tpu.memory_space<vmem>>, vector<8x1xf32>,
    %c0_18 = arith.constant 0 : index
    %c0_19 = arith.constant 0 : index
    %28 = vector.load %arg4[%c0_18, %c0_19] : memref<8x2048xf32, #tpu.memory_space<vmem>>, vector<8x2048xf32>
    tpu.vector_store %arg4[%c0_18, %c0_19], %10 {strides = array<i32>} : memref<8x2048xf32, #tpu.memory_space<vmem>>, vector<8x2048xf32>,
    %29 = arith.index_cast %arg0 : i32 to index
    %c0_20 = arith.constant 0 : index
    %c0_21 = arith.constant 0 : index
    %30 = vector.load %arg5[%29, %c0_20, %c0_21] : memref<3x8x2048xf32, #tpu.memory_space<vmem>>, vector<1x8x2048xf32>
    %31 = vector.shape_cast %30 : vector<1x8x2048xf32> to vector<8x2048xf32>
    %32 = vector.shape_cast %10 : vector<8x2048xf32> to vector<1x8x2048xf32>
    tpu.vector_store %arg5[%29, %c0_20, %c0_21], %32 {strides = array<i32>} : memref<3x8x2048xf32, #tpu.memory_space<vmem>>, vector<1x8x2048xf32>,
    %c2_i32 = arith.constant 2 : i32
    %33 = arith.cmpi eq, %arg0, %c2_i32 : i32
    %34 = arith.extui %33 : i1 to i32
    %c0_i32_22 = arith.constant 0 : i32
    %35 = arith.cmpi ne, %34, %c0_i32_22 : i32
    scf.if %35 {
      %c0_23 = arith.constant 0 : index
      %c0_24 = arith.constant 0 : index
      %36 = vector.load %arg6[%c0_23, %c0_24] : memref<8x1xf32, #tpu.memory_space<vmem>>, vector<8x1xf32>
      %c0_25 = arith.constant 0 : index
      %c0_26 = arith.constant 0 : index
      %37 = vector.load %arg7[%c0_25, %c0_26] : memref<8x1xf32, #tpu.memory_space<vmem>>, vector<8x1xf32>
      %38 = math.log %37 : vector<8x1xf32>
      %39 = arith.addf %36, %38 : vector<8x1xf32>
      %c0_27 = arith.constant 0 : index
      %c0_28 = arith.constant 0 : index
      %c0_29 = arith.constant 0 : index
      %40 = vector.load %arg5[%c0_27, %c0_28, %c0_29] : memref<3x8x2048xf32, #tpu.memory_space<vmem>>, vector<3x8x2048xf32>
      %41 = vector.shape_cast %39 : vector<8x1xf32> to vector<1x8x1xf32>
      %42 = vector.broadcast %41 : vector<1x8x1xf32> to vector<3x8x2048xf32>
      %43 = arith.subf %40, %42 : vector<3x8x2048xf32>
      %c0_30 = arith.constant 0 : index
      %c0_31 = arith.constant 0 : index
      %c0_32 = arith.constant 0 : index
      %44 = vector.load %arg5[%c0_30, %c0_31, %c0_32] : memref<3x8x2048xf32, #tpu.memory_space<vmem>>, vector<3x8x2048xf32>
      tpu.vector_store %arg5[%c0_30, %c0_31, %c0_32], %43 {strides = array<i32>} : memref<3x8x2048xf32, #tpu.memory_space<vmem>>, vector<3x8x2048xf32>,
    } else {
    }
    return
  }
  func.func @transform_0(%arg0: i32) -> (i32, i32) {
    %c0_i32 = arith.constant 0 : i32
    %c0_i32_0 = arith.constant 0 : i32
    %c0_i32_1 = arith.constant 0 : i32
    return %c0_i32, %c0_i32_0 : i32, i32
  }
  func.func @transform_1(%arg0: i32) -> (i32, i32) {
    %c0_i32 = arith.constant 0 : i32
    %c0_i32_0 = arith.constant 0 : i32
    return %c0_i32, %arg0 : i32, i32
  }
  func.func @transform_2(%arg0: i32) -> (i32, i32, i32) {
    %c0_i32 = arith.constant 0 : i32
    %c0_i32_0 = arith.constant 0 : i32
    %c0_i32_1 = arith.constant 0 : i32
    %c0_i32_2 = arith.constant 0 : i32
    return %c0_i32, %c0_i32_0, %c0_i32_1 : i32, i32, i32
  }
  func.func @transform_3(%arg0: i32) -> (i32, i32) {
    %c0_i32 = arith.constant 0 : i32
    %c0_i32_0 = arith.constant 0 : i32
    return %c0_i32, %arg0 : i32, i32
  }
  func.func @transform_4(%arg0: i32) -> (i32, i32, i32) {
    %c0_i32 = arith.constant 0 : i32
    %c0_i32_0 = arith.constant 0 : i32
    %c0_i32_1 = arith.constant 0 : i32
    %c0_i32_2 = arith.constant 0 : i32
    return %c0_i32, %c0_i32_0, %c0_i32_1 : i32, i32, i32
  }
}

</mosaic_0001>

<bundles_post_ra>
// kernel: tpu_custom_call.1
= control target key start
LH: loop header
LB: loop body
LE: loop exit
PB: predicated region body
PF: predicated region fallthrough
CT: control target
= control target key end

     0   :  { %10 = vsyncpa [#allocation5], 0  ;;  %s2327_s0 = inlined_call_operand.hbm [shape: bf16[8,32], index: 0, kind: input, shape index: {}]   ;;  %s2328_s1 = inlined_call_operand.hbm [shape: bf16[32,6144], index: 1, kind: input, shape index: {}]   ;;  %s2329_s2 = inlined_call_operand.hbm [shape: f32[3,1,2048], index: 2, kind: input, shape index: {}]   ;;  %s2330_s3 = inlined_call_operand.hbm [shape: f32[8,6144], index: 3, kind: output, shape index: {0}]   ;;  %s2331_s4 = inlined_call_operand.hbm [shape: f32[3,8,2048], index: 4, kind: output, shape index: {1}]  }
   0x1   :  { %11 = vsyncpa [#allocation8], 0 }
   0x2   :  { %13 = vsyncpa [#allocation8 + $0x1], 0 }
   0x3   :  { %14 = vsyncpa [#allocation6], 0 }
   0x4   :  { %16 = vsyncpa [#allocation6 + $0x1], 0 }
   0x5   :  { %17 = vsyncpa [#allocation12], 0  ;;  %s1710_s15 = smov 0   ;;  %s1712_s16 = smov 0  }
   0x6   :  { %s1714_s17 = smov 0   ;;  %s1716_s18 = smov 0  }
   0x7 LB: > { %s1731_s19 = sadd.s32 4294967295, %s1667_s18   ;;  %s1287_s20 = sadd.s32 4294967294, %s1667_s18   ;;  %s1667_s18 = sphi %s1716_s18, %s2365_s18   ;;  %s1663_s17 = sphi %s1714_s17, %s2364_s17   ;;  %s1659_s16 = sphi %s1712_s16, %s2363_s16   ;;  %s1655_s15 = sphi %s1710_s15, %s2362_s15  }
   0x8   : > { %s1735_s21 = sadd.s32 1, %s1667_s18   ;;  %s51_s22 = sadd.s32 1, %s1663_s17 }
   0x9   : > { %s48_s23 = ssub.s32 %s1667_s18, %s1735_s21  ;;  %p58_p0 = scmp.ne.s32.totalorder %s1663_s17, %s1659_s16 }
   0xa   : > { %p49_p1 = scmp.eq.s32.totalorder %s48_s23, 0  ;;  %p59_p2 = scmp.eq.s32.totalorder %s1667_s18, 0 }
   0xb   : > { %p64_p3 = scmp.ne.s32.totalorder %s1659_s16, %s1655_s15  ;;  %p2333_p4 = scmp.eq.s32.totalorder %s1731_s19, 0 }
   0xc   : > { %s1747_s24 = scalar_select %p49_p1, %s1663_s17, %s51_s22  }
   0xd   : > { %p1749_p5 = por %p59_p2, %p58_p0  ;;  %p1755_p6 = por %p2333_p4, %p64_p3 }
   0xe   : > { %p2332_p7 = scmp.eq.s32.totalorder %s1731_s19, 2  ;;  %p115_p8 = scmp.eq.s32.totalorder %s1287_s20, 2 }
   0xf   : > { %s2338_s25 = scalar_select %p1749_p5, 1, 0 }
  0x10   : > { %s2339_s26 = scalar_select %p1755_p6, 1, 0 }
  0x11   : > { %p1288_p9 = scmp.ge.s32.totalorder %s1667_s18, 1  ;;  %p143_p10 = scmp.lt.s32.totalorder %s1667_s18, 4 }
  0x12   : > { %p1764_p11 = por %p2332_p7, %p58_p0  ;;  %p1768_p12 = por %p115_p8, %p64_p3 }
  0x13   : > { %p1772_p13 = pnand %p1288_p9, %p143_p10  ;;  %s1669_s30 = smov [#allocation9]  }
  0x14   : > { %s2340_s27 = scalar_select %p1764_p11, 1, 0 }
  0x15   : > { %s2341_s28 = scalar_select %p1768_p12, 1, 0 }
  0x16   : > { %s2342_s29 = scalar_select %p1772_p13, 1, 0 }
  0x17   : > { %p1370_p2 = pneg %p1772_p13  ;;  %s166_s5 = sshll.u32 %s1669_s30, 4  ;;  %s167_s5 = int_to_ptr.vmem [resolvable:$true] %s166_s5 }
  0x18   : > { %s1670_s7 = smov [#allocation4]   ;;  %s1477_s11 = scalar_lea.hbm %s2329_s2, 768 }
  0x19   : > { %p1781_p0 = pnand %p1370_p2, %p2333_p4  ;;  %s156_s8 = sshll.u32 %s1670_s7, 4  ;;  %s157_s8 = int_to_ptr.vmem [resolvable:$true] %s156_s8 }
  0x1a   : > { %p1478_p8 = scmp.ne.s32.totalorder %s2329_s2, %s1477_s11  ;;  %p1484_p7 = scmp.lt.u32.totalorder %s1477_s11, %s2329_s2 }
  0x1b   : > { %p1479_p9 = pneg %p1781_p0 }
  0x1d   : > { %p1480_p10 = pnand %p1479_p9, %p1478_p8 }
  0x1f   : > { %p1481_p2 = pneg %p1480_p10 }
  0x21   : > { %p1486_p1 = pnand %p1484_p7, %p1481_p2 }
  0x23   : > { %1489 = shalt.err (!%p1486_p1)
}
  0x24   : > { %s1490_s22 = scalar_lea.vmem %s167_s5, 768  ;;  %p1498_p11 = scmp.lt.s32.totalorder %s167_s5, %s167_s5 }
  0x25   : > { %p1491_p4 = scmp.ne.s32.totalorder %s167_s5, %s1490_s22  ;;  %p1499_p6 = scmp.lt.s32.totalorder %s1490_s22, %s1490_s22 }
  0x27   : > { %p1493_p3 = pnand %p1491_p4, %p1479_p9  ;;  %p1500_p13 = por %p1499_p6, %p1498_p11 }
  0x29   : > { %p1494_p12 = pneg %p1493_p3 }
  0x2b   : > { %p1501_p5 = pnand %p1500_p13, %p1494_p12 }
  0x2d   : > { %1504 = shalt.err (!%p1501_p5)
}
  0x2e   : > { %s1671_s23 = smov 256   ;;  %s1672_s30 = smov 16  }
  0x2f   : > { %1376 = dma.hbm_to_vmem [thread:$0]  (!%p1781_p0), %s2329_s2, 768, %s167_s5, [#allocation8], %s1671_s23, %s1671_s23, %s1672_s30  }
  0x30   : > { %p2344_p7 = scmp.ne.s32.totalorder %s2338_s25, 0  ;;  %p2345_p1 = scmp.lt.s32.totalorder %s1667_s18, 3 }
  0x31   : > { %s1505_s13 = scalar_lea.hbm %s2327_s0, 64 }
  0x32   : > { %p1812_p4 = pnand %p2345_p1, %p2344_p7  ;;  %p1506_p5 = scmp.ne.s32.totalorder %s2327_s0, %s1505_s13 }
  0x33   : > { %p1512_p12 = scmp.lt.u32.totalorder %s1505_s13, %s2327_s0 }
  0x34   : > { %s2346_s10 = scalar_select %p1812_p4, 1, 0 }
  0x35   : > { %p1508_p6 = pnand %p1506_p5, %p1479_p9 }
  0x37   : > { %p1509_p11 = pneg %p1508_p6 }
  0x39   : > { %p1514_p13 = pnand %p1512_p12, %p1509_p11 }
  0x3b   : > { %1517 = shalt.err (!%p1514_p13)
}
  0x3c   : > { %s1518_s22 = scalar_lea.vmem %s157_s8, 64  ;;  %p1526_p2 = scmp.lt.s32.totalorder %s157_s8, %s157_s8 }
  0x3d   : > { %p1519_p3 = scmp.ne.s32.totalorder %s157_s8, %s1518_s22  ;;  %p1527_p7 = scmp.lt.s32.totalorder %s1518_s22, %s1518_s22 }
  0x3f   : > { %p1521_p8 = pnand %p1519_p3, %p1479_p9  ;;  %p1528_p1 = por %p1527_p7, %p1526_p2 }
  0x41   : > { %p1522_p10 = pneg %p1521_p8 }
  0x43   : > { %p1529_p4 = pnand %p1528_p1, %p1522_p10 }
  0x45   : > { %1532 = shalt.err (!%p1529_p4)
}
  0x46   : > { %1373 = dma.hbm_to_vmem [thread:$0]  (!%p1781_p0), %s2327_s0, 64, %s157_s8, [#allocation5]  }
  0x47   : > { %s180_s7 = sand.u32 1, %s1667_s18   ;;  %s182_s9 = sand.u32 1, %s1663_s17  }
  0x48   : > { %s1292_s11 = sshll.u32 %s182_s9, 8  ;;  %s1351_s12 = sshll.u32 %s1667_s18, 10 }
  0x49   : > { %s1842_s20 = scalar_lea.hbm %s2328_s1, %s1351_s12  ;;  %s184_s6 = scalar_lea.vmem [#allocation7], %s1292_s11 }
  0x4a   : > { %s191_s5 = sshll.u32 %s184_s6, 4  ;;  %s1846_s25 = scalar_lea.sflag [#allocation8], %s180_s7  ;;  %s1844_s5 = int_to_ptr.vmem [resolvable:$true] %s191_s5 }
  0x4b   : > { %s1533_s8 = scalar_lea.hbm %s1842_s20, 4096  ;;  %p2347_p9 = scmp.ne.s32.totalorder %s2346_s10, 0 }
  0x4c   : > { %p1534_p0 = scmp.ne.s32.totalorder %s1842_s20, %s1533_s8  ;;  %s1538_s30 = scalar_lea.hbm %s2328_s1, 12288 }
  0x4d   : > { %p1535_p4 = pneg %p2347_p9  ;;  %p1539_p11 = scmp.lt.u32.totalorder %s1842_s20, %s2328_s1 }
  0x4e   : > { %p1540_p12 = scmp.lt.u32.totalorder %s1538_s30, %s1533_s8  ;;  %p1542_p3 = scmp.lt.u32.totalorder %s1533_s8, %s1842_s20 }
  0x4f   : > { %p1536_p5 = pnand %p1535_p4, %p1534_p0 }
  0x50   : > { %p1541_p13 = por %p1540_p12, %p1539_p11 }
  0x51   : > { %p1537_p6 = pneg %p1536_p5 }
  0x52   : > { %p1543_p8 = por %p1542_p3, %p1541_p13 }
  0x54   : > { %p1544_p10 = pnand %p1543_p8, %p1537_p6 }
  0x56   : > { %1547 = shalt.err (!%p1544_p10)
}
  0x57   : > { %s1548_s7 = scalar_lea.vmem %s1844_s5, 4096  ;;  %s1673_s11 = smov [#allocation7]  }
  0x58   : > { %p1549_p2 = scmp.ne.s32.totalorder %s1844_s5, %s1548_s7  ;;  %s1553_s13 = sshll.u32 %s1673_s11, 4  ;;  %s1554_s13 = int_to_ptr.vmem [resolvable:$false] %s1553_s13 }
  0x59   : > { %s1555_s14 = scalar_lea.vmem %s1554_s13, 8192  ;;  %p1556_p0 = scmp.lt.s32.totalorder %s1844_s5, %s1554_s13 }
  0x5a   : > { %p1551_p7 = pnand %p1549_p2, %p1535_p4  ;;  %p1557_p5 = scmp.lt.s32.totalorder %s1555_s14, %s1548_s7 }
  0x5c   : > { %p1552_p1 = pneg %p1551_p7  ;;  %p1558_p11 = por %p1557_p5, %p1556_p0 }
  0x5e   : > { %p1559_p12 = pnand %p1558_p11, %p1552_p1 }
  0x60   : > { %1562 = shalt.err (!%p1559_p12)
}
  0x61   : > { %s1674_s6 = smov 3072   ;;  %s1675_s8 = smov 1024  }
  0x62   : > { %s1676_s22 = smov 64   ;;  %p2348_p4 = scmp.ne.s32.totalorder %s2342_s29, 0 }
  0x63   : > { %1380 = dma.hbm_to_vmem [thread:$0]  (!%p2347_p9), %s1842_s20, 4096, %s1844_s5, %s1846_s25, %s1674_s6, %s1675_s8, %s1676_s22  }
  0x64   : > { %203 = sbr.rel (%p2348_p4) target bundleno = 1076 (0x434), region = 32  ;;  %p2349_p6 = scmp.eq.s32.totalorder (!%p2348_p4), %s1731_s19, 0 }
  0x6b   : > { %1634 = dma.done.wait (%p2349_p6), [#allocation5], 64   ;;  %p2350_p13 = pmov %p2349_p6 }
  0x6c   : > { %s209_s23 = sand.u32 1, %s1731_s19   ;;  %s1882_s30 = sand.u32 1, %s1659_s16  }
  0x6d   : > { %1636 = vsyncadd (%p2350_p13), [#allocation5], 4294967232  ;;  %s1297_s9 = sshll.u32 %s1882_s30, 8  ;;  %s210_s12 = scalar_lea.sflag [#allocation8], %s209_s23 }
  0x6e   : > { %s1885_s10 = scalar_lea.vmem [#allocation7], %s1297_s9  ;;  %p2351_p9 = scmp.ne.s32.totalorder %s2339_s26, 0 }
  0x70   : > { %1638 = dma.done.wait (%p2351_p9), %s210_s12, 4096  }
  0x71   : > { %1640 = vsyncadd (%p2351_p9), %s210_s12, 4294963200  ;;  %p2352_p3 = pmov %p2349_p6 }
  0x73   : > { %1642 = dma.done.wait (%p2352_p3), [#allocation8], 768   ;;  %p2353_p8 = pmov %p2352_p3 }
  0x74   : > { %s1299_s29 = sshll.u32 %s1882_s30, 7  ;;  %p2354_p10 = scmp.ne.s32.totalorder %s1731_s19, 0 }
  0x75   : > { %1644 = vsyncadd (%p2353_p8), [#allocation8], 4294966528  ;;  %s1896_s20 = scalar_lea.vmem [#allocation10], %s1299_s29  ;;  %vm249_vm0 = vcmask (!%p2354_p10), 7168   ;;  %v1677_v0 = vmov (!%p2354_p10), -inf   ;;  %v1678_v1 = vmov (!%p2354_p10), 0.0  }
  0x76   : > { %248 = sbr.rel (%p2354_p10) target bundleno = 125 (0x7d), region = 48  ;;  %250 = vst.msk [vmem:[#allocation2] sm:$0xff] (!%p2354_p10), %vm249_vm0, %v1677_v0  ;;  %251 = vst.msk [vmem:[#allocation3] sm:$0xff] (!%p2354_p10), %vm249_vm0, %v1678_v1 }
  0x7d PF: > { %v253_v2 = vld [vmem:[%s1885_s10] sm:$0xff]  ;;  %v254_v4 = vld [vmem:[%s1885_s10 + $0x8] sm:$0xff]  ;;  %v1679_v10 = vmov 0   ;;  %v255_v17 = vld [vmem:[%s1885_s10 + $0x10] sm:$0xff]  ;;  %vm531_vm1 = vcmask 261120   ;;  %s1301_s26 = sshll.u32 %s1731_s19, 4 }
  0x7e   : > { %v261_v3 = vld [vmem:[%s1885_s10 + $0x40] sm:$0xff]  ;;  %v262_v6 = vld [vmem:[%s1885_s10 + $0x48] sm:$0xff]  ;;  %567 = vmatprep.mubr.bf16.mxu0 %v1679_v10  ;;  %608 = vmatprep.mubr.bf16.mxu1 %v1679_v10  ;;  %v263_v18 = vld [vmem:[%s1885_s10 + $0x50] sm:$0xff]  ;;  %s1963_s5 = scalar_lea.vmem [#allocation9], %s1301_s26  ;;  %s1352_s25 = sshll.u32 %s1731_s19, 7  ;;  %vm958_vm2 = vcmask 7168  }
  0x7f   : > { %v1303_v5 = vcombine.high %v253_v2, %v261_v3  ;;  %v1302_v7 = vcombine.low %v253_v2, %v261_v3  ;;  %v269_v8 = vld [vmem:[%s1885_s10 + $0x80] sm:$0xff]  ;;  %v1305_v11 = vcombine.high %v254_v4, %v262_v6  ;;  %v1304_v12 = vcombine.low %v254_v4, %v262_v6  ;;  %v270_v14 = vld [vmem:[%s1885_s10 + $0x88] sm:$0xff]  ;;  %1439 = vset.pattern.permute.xlu0 %v1679_v10  ;;  %v256_v19 = vld [vmem:[%s1885_s10 + $0x18] sm:$0xff]  ;;  %s1981_s7 = scalar_lea.vmem [#allocation11], %s1352_s25  ;;  %p1343_p2 = scmp.ne.s32.totalorder %s1731_s19, 2 }
  0x80   : > { %v277_v9 = vld [vmem:[%s1885_s10 + $0xc0] sm:$0xff]  ;;  %v278_v15 = vld [vmem:[%s1885_s10 + $0xc8] sm:$0xff]  ;;  %v264_v21 = vld [vmem:[%s1885_s10 + $0x58] sm:$0xff]  ;;  %v1307_v23 = vcombine.high %v255_v17, %v263_v18  ;;  %v1306_v30 = vcombine.low %v255_v17, %v263_v18  ;;  %v291_v4 = vlaneseq }
  0x81   : > { %v1319_v13 = vcombine.high %v269_v8, %v277_v9  ;;  %535 = vmatprep.subr.bf16.mxu0 %v1303_v5  ;;  %v1321_v16 = vcombine.high %v270_v14, %v278_v15  ;;  %576 = vmatprep.subr.bf16.mxu1 %v1305_v11  ;;  %v1318_v20 = vcombine.low %v269_v8, %v277_v9  ;;  %v271_v25 = vld [vmem:[%s1885_s10 + $0x90] sm:$0xff]  ;;  %v272_v27 = vld [vmem:[%s1885_s10 + $0x98] sm:$0xff]  ;;  %v257_v34 = vld [vmem:[%s1885_s10 + $0x20] sm:$0xff] }
  0x82   : > { %536 = vmatpush1.bf16.msra.mxu0 %v1302_v7  ;;  %577 = vmatpush1.bf16.msra.mxu1 %v1304_v12  ;;  %v1320_v22 = vcombine.low %v270_v14, %v278_v15  ;;  %v1309_v24 = vcombine.high %v256_v19, %v264_v21  ;;  %v279_v26 = vld [vmem:[%s1885_s10 + $0xd0] sm:$0xff]  ;;  %v280_v28 = vld [vmem:[%s1885_s10 + $0xd8] sm:$0xff]  ;;  %v1308_v31 = vcombine.low %v256_v19, %v264_v21  ;;  %v265_v35 = vld [vmem:[%s1885_s10 + $0x60] sm:$0xff]  ;;  %v1960_v5 = vshrl.u32 %v291_v4, 7 }
  0x83   : > { %537 = vmatprep.subr.bf16.mxu0 %v1319_v13  ;;  %578 = vmatprep.subr.bf16.mxu1 %v1321_v16  ;;  %v1919_v29 = vld [vmem:[#allocation4] sm:$0xf]  ;;  %v1323_v32 = vcombine.high %v271_v25, %v279_v26  ;;  %v1325_v33 = vcombine.high %v272_v27, %v280_v28  ;;  %v258_v36 = vld [vmem:[%s1885_s10 + $0x28] sm:$0xff]  ;;  %v1322_v38 = vcombine.low %v271_v25, %v279_v26  ;;  %v273_v42 = vld [vmem:[%s1885_s10 + $0xa0] sm:$0xff] }
  0x84   : > { %v266_v37 = vld [vmem:[%s1885_s10 + $0x68] sm:$0xff]  ;;  %v1324_v39 = vcombine.low %v272_v27, %v280_v28  ;;  %v1311_v40 = vcombine.high %v257_v34, %v265_v35  ;;  %v281_v43 = vld [vmem:[%s1885_s10 + $0xe0] sm:$0xff]  ;;  %v1310_v46 = vcombine.low %v257_v34, %v265_v35  ;;  %v259_v50 = vld [vmem:[%s1885_s10 + $0x30] sm:$0xff]  ;;  %v293_v6 = vsub.s32 0, %v1960_v5 }
  0x85   : > { %v1313_v41 = vcombine.high %v258_v36, %v266_v37  ;;  %v274_v44 = vld [vmem:[%s1885_s10 + $0xa8] sm:$0xff]  ;;  %v1312_v47 = vcombine.low %v258_v36, %v266_v37  ;;  %v1327_v48 = vcombine.high %v273_v42, %v281_v43  ;;  %v267_v51 = vld [vmem:[%s1885_s10 + $0x70] sm:$0xff]  ;;  %v260_v52 = vld [vmem:[%s1885_s10 + $0x38] sm:$0xff]  ;;  %v1326_v54 = vcombine.low %v273_v42, %v281_v43 }
  0x86   : > { %538 = vmatpush1.bf16.msra.mxu0 %v1318_v20  ;;  %579 = vmatpush1.bf16.msra.mxu1 %v1320_v22  ;;  %v282_v45 = vld [vmem:[%s1885_s10 + $0xe8] sm:$0xff]  ;;  %v268_v53 = vld [vmem:[%s1885_s10 + $0x78] sm:$0xff]  ;;  %v1315_v56 = vcombine.high %v259_v50, %v267_v51  ;;  %v275_v58 = vld [vmem:[%s1885_s10 + $0xb0] sm:$0xff]  ;;  %v1314_v62 = vcombine.low %v259_v50, %v267_v51  ;;  %v301_v8 = vsub.s32 2, %v1960_v5  ;;  %v297_v9 = vsub.s32 1, %v1960_v5 }
  0x87   : > { %617 = vmatprep.subr.bf16.mxu0 %v1307_v23  ;;  %658 = vmatprep.subr.bf16.mxu1 %v1309_v24  ;;  %v1329_v49 = vcombine.high %v274_v44, %v282_v45  ;;  %v1328_v55 = vcombine.low %v274_v44, %v282_v45  ;;  %v1317_v57 = vcombine.high %v260_v52, %v268_v53  ;;  %v283_v59 = vld [vmem:[%s1885_s10 + $0xf0] sm:$0xff]  ;;  %v276_v60 = vld [vmem:[%s1885_s10 + $0xb8] sm:$0xff]  ;;  %v309_v19 = vsub.s32 4, %v1960_v5 }
  0x88   : > { %v284_v61 = vld [vmem:[%s1885_s10 + $0xf8] sm:$0xff]  ;;  %v1316_v63 = vcombine.low %v260_v52, %v268_v53  ;;  %v1331_v0 = vcombine.high %v275_v58, %v283_v59  ;;  %v1330_v2 = vcombine.low %v275_v58, %v283_v59  ;;  %v287_v7 = vld [vmem:[%s1963_s5] sm:$0xff]  ;;  %v317_v24 = vsub.s32 6, %v1960_v5 }
  0x89   : > { %1334 = vmatmul.mubr.msk.bf16.vlgmr.msra.gmra.mrb[0].mxu0 %vm531_vm1, %v1919_v29  ;;  %1335 = vmatmul.mubr.msk.bf16.vlgmr.msra.gmra.mrb[0].mxu1 %vm531_vm1, %v1919_v29  ;;  %v1333_v1 = vcombine.high %v276_v60, %v284_v61  ;;  %v1332_v3 = vcombine.low %v276_v60, %v284_v61  ;;  %v294_v11 = vrot.slane %v287_v7, %v293_v6  ;;  %v313_v25 = vsub.s32 5, %v1960_v5  ;;  %v288_v43 = vld [vmem:[%s1963_s5 + $0x8] sm:$0xff] }
  0x8a   : > { %618 = vmatpush1.bf16.msra.mxu0 %v1306_v30  ;;  %659 = vmatpush1.bf16.msra.mxu1 %v1308_v31  ;;  %v302_v12 = vrot.slane %v287_v7, %v301_v8  ;;  %v298_v13 = vrot.slane %v287_v7, %v297_v9  ;;  %v310_v31 = vrot.slane %v287_v7, %v309_v19 }
  0x8b   : > { %619 = vmatprep.subr.bf16.mxu0 %v1323_v32  ;;  %660 = vmatprep.subr.bf16.mxu1 %v1325_v33  ;;  %v318_v32 = vrot.slane %v287_v7, %v317_v24  ;;  %v314_v33 = vrot.slane %v287_v7, %v313_v25  ;;  %v330_v50 = vrot.slane %v288_v43, %v297_v9 }
  0x8c   : > { %649 = vmatprep.mubr.bf16.mxu0 %v1679_v10  ;;  %690 = vmatprep.mubr.bf16.mxu1 %v1679_v10 }
  0x8e   : > { %620 = vmatpush1.bf16.msra.mxu0 %v1322_v38  ;;  %661 = vmatpush1.bf16.msra.mxu1 %v1324_v39 }
  0x8f   : > { %699 = vmatprep.subr.bf16.mxu0 %v1311_v40  ;;  %740 = vmatprep.subr.bf16.mxu1 %v1313_v41 }
  0x91   : > { %1336 = vmatmul.mubr.msk.bf16.vlgmr.msra.gmra.mrb[4].mxu0 %vm531_vm1, %v1919_v29  ;;  %1337 = vmatmul.mubr.msk.bf16.vlgmr.msra.gmra.mrb[4].mxu1 %vm531_vm1, %v1919_v29 }
  0x92   : > { %700 = vmatpush1.bf16.msra.mxu0 %v1310_v46  ;;  %741 = vmatpush1.bf16.msra.mxu1 %v1312_v47 }
  0x93   : > { %701 = vmatprep.subr.bf16.mxu0 %v1327_v48  ;;  %742 = vmatprep.subr.bf16.mxu1 %v1329_v49  ;;  %v326_v48 = vrot.slane %v288_v43, %v293_v6  ;;  %v334_v49 = vrot.slane %v288_v43, %v301_v8 }
  0x94   : > { %731 = vmatprep.mubr.bf16.mxu0 %v1679_v10  ;;  %772 = vmatprep.mubr.bf16.mxu1 %v1679_v10 }
  0x96   : > { %702 = vmatpush1.bf16.msra.mxu0 %v1326_v54  ;;  %743 = vmatpush1.bf16.msra.mxu1 %v1328_v55 }
  0x97   : > { %781 = vmatprep.subr.bf16.mxu0 %v1315_v56  ;;  %822 = vmatprep.subr.bf16.mxu1 %v1317_v57 }
  0x99   : > { %1338 = vmatmul.mubr.msk.bf16.vlgmr.msra.gmra.mrb[8].mxu0 %vm531_vm1, %v1919_v29  ;;  %1339 = vmatmul.mubr.msk.bf16.vlgmr.msra.gmra.mrb[8].mxu1 %vm531_vm1, %v1919_v29 }
  0x9a   : > { %782 = vmatpush1.bf16.msra.mxu0 %v1314_v62  ;;  %823 = vmatpush1.bf16.msra.mxu1 %v1316_v63 }
  0x9b   : > { %783 = vmatprep.subr.bf16.mxu0 %v1331_v0  ;;  %824 = vmatprep.subr.bf16.mxu1 %v1333_v1  ;;  %v342_v0 = vrot.slane %v288_v43, %v309_v19  ;;  %v350_v1 = vrot.slane %v288_v43, %v317_v24 }
  0x9c   : > { %813 = vmatprep.mubr.bf16.mxu0 %v1679_v10  ;;  %854 = vmatprep.mubr.bf16.mxu1 %v1679_v10  ;;  %v305_v10 = vsub.s32 3, %v1960_v5 }
  0x9e   : > { %784 = vmatpush1.bf16.msra.mxu0 %v1330_v2  ;;  %825 = vmatpush1.bf16.msra.mxu1 %v1332_v3  ;;  %v306_v14 = vrot.slane %v287_v7, %v305_v10  ;;  %v338_v51 = vrot.slane %v288_v43, %v305_v10  ;;  %v346_v2 = vrot.slane %v288_v43, %v313_v25 }
  0xa1   : > { %1340 = vmatmul.mubr.msk.bf16.vlgmr.msra.gmra.mrb[12].mxu0 %vm531_vm1, %v1919_v29  ;;  %1341 = vmatmul.mubr.msk.bf16.vlgmr.msra.gmra.mrb[12].mxu1 %vm531_vm1, %v1919_v29  ;;  %v321_v29 = vsub.s32 7, %v1960_v5 }
  0xa3   : > { %v322_v34 = vrot.slane %v287_v7, %v321_v29  ;;  %v354_v3 = vrot.slane %v288_v43, %v321_v29 }
 0x15c   : > { %v569_v15 = vpop.f32.mrb[0].mxu0  ;;  %v610_v17 = vpop.f32.mrb[0].mxu1 }
 0x15d   : > { %v1970_v16 = vadd.f32 %v569_v15, %v294_v11  ;;  %v571_v18 = vpop.f32.mrb[1].mxu0  ;;  %v1973_v20 = vadd.f32 %v610_v17, %v302_v12  ;;  %v612_v22 = vpop.f32.mrb[1].mxu1 }
 0x15e   : > { %v1975_v21 = vadd.f32 %v571_v18, %v298_v13  ;;  %v573_v23 = vpop.f32.mrb[2].mxu0  ;;  %v1985_v26 = vadd.f32 %v612_v22, %v306_v14  ;;  %v614_v27 = vpop.f32.mrb[2].mxu1 }
 0x15f   : > { %961 = vst [vmem:[%s1896_s20] sm:$0xff] %v1970_v16  ;;  %979 = vst [vmem:[%s1981_s7] sm:$0xff] %v1970_v16  ;;  %v574_v28 = vpop.f32.mrb[3].mxu0  ;;  %v615_v30 = vpop.f32.mrb[3].mxu1 }
 0x160   : > { %963 = vst [vmem:[%s1896_s20 + $0x10] sm:$0xff] %v1973_v20  ;;  %981 = vst [vmem:[%s1981_s7 + $0x10] sm:$0xff] %v1973_v20 }
 0x161   : > { %962 = vst [vmem:[%s1896_s20 + $0x8] sm:$0xff] %v1975_v21  ;;  %980 = vst [vmem:[%s1981_s7 + $0x8] sm:$0xff] %v1975_v21 }
 0x162   : > { %964 = vst [vmem:[%s1896_s20 + $0x18] sm:$0xff] %v1985_v26  ;;  %982 = vst [vmem:[%s1981_s7 + $0x18] sm:$0xff] %v1985_v26 }
 0x164   : > { %v651_v35 = vpop.f32.mrb[4].mxu0  ;;  %v692_v37 = vpop.f32.mrb[4].mxu1 }
 0x165   : > { %v2006_v36 = vadd.f32 %v651_v35, %v310_v31  ;;  %v653_v38 = vpop.f32.mrb[5].mxu0  ;;  %v2008_v39 = vadd.f32 %v692_v37, %v318_v32  ;;  %v694_v41 = vpop.f32.mrb[5].mxu1  ;;  %v2101_v35 = vld [vmem:[#allocation2] sm:$0xff] }
 0x166   : > { %v2010_v40 = vadd.f32 %v653_v38, %v314_v33  ;;  %v655_v42 = vpop.f32.mrb[6].mxu0  ;;  %v2017_v44 = vadd.f32 %v694_v41, %v322_v34  ;;  %v696_v45 = vpop.f32.mrb[6].mxu1 }
 0x167   : > { %965 = vst [vmem:[%s1896_s20 + $0x20] sm:$0xff] %v2006_v36  ;;  %983 = vst [vmem:[%s1981_s7 + $0x20] sm:$0xff] %v2006_v36  ;;  %v656_v46 = vpop.f32.mrb[7].mxu0  ;;  %v697_v47 = vpop.f32.mrb[7].mxu1  ;;  %v863_v4 = vmax.f32 %v1970_v16, %v2006_v36  ;;  %v865_v8 = vmax.f32 %v1973_v20, %v2008_v39 }
 0x168   : > { %967 = vst [vmem:[%s1896_s20 + $0x30] sm:$0xff] %v2008_v39  ;;  %985 = vst [vmem:[%s1981_s7 + $0x30] sm:$0xff] %v2008_v39  ;;  %v864_v7 = vmax.f32 %v1975_v21, %v2010_v40  ;;  %v866_v5 = vmax.f32 %v1985_v26, %v2017_v44 }
 0x169   : > { %966 = vst [vmem:[%s1896_s20 + $0x28] sm:$0xff] %v2010_v40  ;;  %984 = vst [vmem:[%s1981_s7 + $0x28] sm:$0xff] %v2010_v40 }
 0x16a   : > { %968 = vst [vmem:[%s1896_s20 + $0x38] sm:$0xff] %v2017_v44  ;;  %986 = vst [vmem:[%s1981_s7 + $0x38] sm:$0xff] %v2017_v44 }
 0x16c   : > { %v733_v52 = vpop.f32.mrb[8].mxu0  ;;  %v774_v54 = vpop.f32.mrb[8].mxu1 }
 0x16d   : > { %v2031_v53 = vadd.f32 %v733_v52, %v326_v48  ;;  %v735_v55 = vpop.f32.mrb[9].mxu0  ;;  %v2033_v56 = vadd.f32 %v774_v54, %v334_v49  ;;  %v776_v58 = vpop.f32.mrb[9].mxu1 }
 0x16e   : > { %v2035_v57 = vadd.f32 %v735_v55, %v330_v50  ;;  %v737_v59 = vpop.f32.mrb[10].mxu0  ;;  %v2041_v60 = vadd.f32 %v776_v58, %v338_v51  ;;  %v778_v61 = vpop.f32.mrb[10].mxu1 }
 0x16f   : > { %969 = vst [vmem:[%s1896_s20 + $0x40] sm:$0xff] %v2031_v53  ;;  %987 = vst [vmem:[%s1981_s7 + $0x40] sm:$0xff] %v2031_v53  ;;  %v738_v62 = vpop.f32.mrb[11].mxu0  ;;  %v779_v63 = vpop.f32.mrb[11].mxu1  ;;  %v867_v12 = vmax.f32 %v863_v4, %v2031_v53  ;;  %v869_v19 = vmax.f32 %v865_v8, %v2033_v56 }
 0x170   : > { %971 = vst [vmem:[%s1896_s20 + $0x50] sm:$0xff] %v2033_v56  ;;  %989 = vst [vmem:[%s1981_s7 + $0x50] sm:$0xff] %v2033_v56  ;;  %v868_v18 = vmax.f32 %v864_v7, %v2035_v57  ;;  %v870_v25 = vmax.f32 %v866_v5, %v2041_v60 }
 0x171   : > { %970 = vst [vmem:[%s1896_s20 + $0x48] sm:$0xff] %v2035_v57  ;;  %988 = vst [vmem:[%s1981_s7 + $0x48] sm:$0xff] %v2035_v57 }
 0x172   : > { %972 = vst [vmem:[%s1896_s20 + $0x58] sm:$0xff] %v2041_v60  ;;  %990 = vst [vmem:[%s1981_s7 + $0x58] sm:$0xff] %v2041_v60 }
 0x174   : > { %v815_v6 = vpop.f32.mrb[12].mxu0  ;;  %v856_v10 = vpop.f32.mrb[12].mxu1 }
 0x175   : > { %v2067_v9 = vadd.f32 %v815_v6, %v342_v0  ;;  %v817_v11 = vpop.f32.mrb[13].mxu0  ;;  %v2072_v13 = vadd.f32 %v856_v10, %v350_v1  ;;  %v858_v15 = vpop.f32.mrb[13].mxu1 }
 0x176   : > { %v2074_v14 = vadd.f32 %v817_v11, %v346_v2  ;;  %v819_v17 = vpop.f32.mrb[14].mxu0  ;;  %v2082_v22 = vadd.f32 %v858_v15, %v354_v3  ;;  %v860_v23 = vpop.f32.mrb[14].mxu1 }
 0x177   : > { %973 = vst [vmem:[%s1896_s20 + $0x60] sm:$0xff] %v2067_v9  ;;  %991 = vst [vmem:[%s1981_s7 + $0x60] sm:$0xff] %v2067_v9  ;;  %v820_v24 = vpop.f32.mrb[15].mxu0  ;;  %v871_v27 = vmax.f32 %v867_v12, %v2067_v9  ;;  %v861_v28 = vpop.f32.mrb[15].mxu1  ;;  %v873_v30 = vmax.f32 %v869_v19, %v2072_v13 }
 0x178   : > { %975 = vst [vmem:[%s1896_s20 + $0x70] sm:$0xff] %v2072_v13  ;;  %993 = vst [vmem:[%s1981_s7 + $0x70] sm:$0xff] %v2072_v13  ;;  %v872_v29 = vmax.f32 %v868_v18, %v2074_v14  ;;  %v874_v31 = vmax.f32 %v870_v25, %v2082_v22 }
 0x179   : > { %974 = vst [vmem:[%s1896_s20 + $0x68] sm:$0xff] %v2074_v14  ;;  %992 = vst [vmem:[%s1981_s7 + $0x68] sm:$0xff] %v2074_v14 }
 0x17a   : > { %976 = vst [vmem:[%s1896_s20 + $0x78] sm:$0xff] %v2082_v22  ;;  %994 = vst [vmem:[%s1981_s7 + $0x78] sm:$0xff] %v2082_v22  ;;  %v875_v32 = vmax.f32 %v871_v27, %v872_v29  ;;  %v876_v33 = vmax.f32 %v873_v30, %v874_v31 }
 0x17c   : > { %v877_v34 = vmax.f32 %v875_v32, %v876_v33 }
 0x17e   : > { %878 = vmax.xlane.f32.xlu0 %v877_v34 }
 0x20b   : > { %v879_v37 = vpop.xlane.xlu0 %878 }
 0x20c   : > { %v2104_v38 = vmax.f32 %v2101_v35, %v879_v37 }
 0x20e   : > { %v883_v41 = vsub.f32 %v2101_v35, %v2104_v38  ;;  %960 = vst.msk [vmem:[#allocation2] sm:$0xff] %vm958_vm2, %v2104_v38  ;;  %889 = vperm.xlu0 %1439, %v2104_v38   ;;  %v1004_v38 = vld [vmem:[#allocation11] sm:$0xff] (!%p1343_p2) }
 0x28d   : > { %v890_v42 = vpop.permute.xlu0 %889 }
 0x28e   : > { %v892_v43 = vsub.f32 %v1970_v16, %v890_v42  ;;  %v893_v45 = vsub.f32 %v1975_v21, %v890_v42  ;;  %v894_v46 = vsub.f32 %v1973_v20, %v890_v42  ;;  %v895_v47 = vsub.f32 %v1985_v26, %v890_v42 }
 0x28f   : > { %v896_v50 = vsub.f32 %v2006_v36, %v890_v42  ;;  %v897_v52 = vsub.f32 %v2010_v40, %v890_v42  ;;  %v898_v55 = vsub.f32 %v2008_v39, %v890_v42  ;;  %v899_v21 = vsub.f32 %v2017_v44, %v890_v42 }
 0x290   : > { %v908_v48 = vmul.f32 1.442695, %v892_v43  ;;  %v910_v49 = vmul.f32 1.442695, %v893_v45  ;;  %v912_v51 = vmul.f32 1.442695, %v894_v46  ;;  %v900_v26 = vsub.f32 %v2031_v53, %v890_v42 }
 0x291   : > { %v914_v54 = vmul.f32 1.442695, %v895_v47  ;;  %v916_v16 = vmul.f32 1.442695, %v896_v50  ;;  %v918_v20 = vmul.f32 1.442695, %v897_v52  ;;  %v901_v36 = vsub.f32 %v2035_v57, %v890_v42 }
 0x292   : > { %1440 = vpow2.f32 %v908_v48  ;;  %v920_v58 = vmul.f32 1.442695, %v898_v55  ;;  %v922_v59 = vmul.f32 1.442695, %v899_v21  ;;  %v902_v62 = vsub.f32 %v2033_v56, %v890_v42  ;;  %v882_v48 = vld [vmem:[#allocation3] sm:$0xff] }
 0x293   : > { %1442 = vpow2.f32 %v910_v49  ;;  %v924_v39 = vmul.f32 1.442695, %v900_v26  ;;  %v903_v44 = vsub.f32 %v2041_v60, %v890_v42  ;;  %v926_v1 = vmul.f32 1.442695, %v901_v36  ;;  %v1007_v26 = vld [vmem:[#allocation11 + $0x18] sm:$0xff] (!%p1343_p2)  ;;  %v1009_v36 = vld [vmem:[#allocation11 + $0x28] sm:$0xff] (!%p1343_p2) }
 0x294   : > { %1444 = vpow2.f32 %v912_v51  ;;  %v904_v3 = vsub.f32 %v2067_v9, %v890_v42  ;;  %v928_v57 = vmul.f32 1.442695, %v902_v62  ;;  %v905_v7 = vsub.f32 %v2074_v14, %v890_v42  ;;  %v1013_v62 = vld [vmem:[#allocation11 + $0x48] sm:$0xff] (!%p1343_p2) }
 0x295   : > { %1446 = vpow2.f32 %v914_v54  ;;  %v930_v56 = vmul.f32 1.442695, %v903_v44  ;;  %v906_v11 = vsub.f32 %v2072_v13, %v890_v42  ;;  %v907_v15 = vsub.f32 %v2082_v22, %v890_v42  ;;  %v2134_v44 = vld [vmem:[#allocation11 + $0x68] sm:$0xff] (!%p1343_p2) }
 0x296   : > { %1448 = vpow2.f32 %v916_v16  ;;  %v932_v60 = vmul.f32 1.442695, %v904_v3  ;;  %v934_v9 = vmul.f32 1.442695, %v905_v7  ;;  %v884_v46 = vmul.f32 1.442695, %v883_v41 }
 0x297   : > { %1450 = vpow2.f32 %v918_v20  ;;  %v936_v19 = vmul.f32 1.442695, %v906_v11  ;;  %v938_v24 = vmul.f32 1.442695, %v907_v15  ;;  %v1680_v54 = vmov (!%p1343_p2), 0   ;;  %v999_v16 = vld [vmem:[#allocation2] sm:$0xff] (!%p1343_p2) }
 0x298   : > { %1452 = vpow2.f32 %v920_v58  ;;  %1474 = vset.pattern.permute.xlu0 (!%p1343_p2), %v1680_v54  ;;  %v1005_v41 = vld [vmem:[#allocation11 + $0x8] sm:$0xff] (!%p1343_p2)  ;;  %v1006_v20 = vld [vmem:[#allocation11 + $0x10] sm:$0xff] (!%p1343_p2)  ;;  %v1008_v58 = vld [vmem:[#allocation11 + $0x20] sm:$0xff] (!%p1343_p2) }
 0x299   : > { %1454 = vpow2.f32 %v922_v59  ;;  %v1010_v59 = vld [vmem:[#allocation11 + $0x30] sm:$0xff] (!%p1343_p2)  ;;  %v2142_v3 = vld [vmem:[#allocation11 + $0x88] sm:$0xff] (!%p1343_p2)  ;;  %v2150_v7 = vld [vmem:[#allocation11 + $0xa0] sm:$0xff] (!%p1343_p2) }
 0x29a   : > { %1456 = vpow2.f32 %v924_v39  ;;  %v1014_v39 = vld [vmem:[#allocation11 + $0x50] sm:$0xff] (!%p1343_p2)  ;;  %v2162_v15 = vld [vmem:[#allocation11 + $0xc0] sm:$0xff] (!%p1343_p2) }
 0x29b   : > { %1458 = vpow2.f32 %v926_v1  ;;  %v2136_v1 = vld [vmem:[#allocation11 + $0x70] sm:$0xff] (!%p1343_p2) }
 0x29c   : > { %v1441_v61 = vpop.eup %1440  ;;  %1460 = vpow2.f32 %v928_v57  ;;  %v2144_v57 = vld [vmem:[#allocation11 + $0x90] sm:$0xff] (!%p1343_p2) }
 0x29d   : > { %v1443_v40 = vpop.eup %1442  ;;  %1462 = vpow2.f32 %v930_v56  ;;  %v2152_v56 = vld [vmem:[#allocation11 + $0xa8] sm:$0xff] (!%p1343_p2)  ;;  %v2214_v54 = vld [vmem:[#allocation11 + $0x130] sm:$0xff] (!%p1343_p2) }
 0x29e   : > { %v940_v63 = vadd.f32 %v1443_v40, %v1441_v61  ;;  %v1445_v0 = vpop.eup %1444  ;;  %1464 = vpow2.f32 %v932_v60  ;;  %v1011_v61 = vld [vmem:[#allocation11 + $0x38] sm:$0xff] (!%p1343_p2)  ;;  %v1012_v40 = vld [vmem:[#allocation11 + $0x40] sm:$0xff] (!%p1343_p2) }
 0x29f   : > { %v1447_v53 = vpop.eup %1446  ;;  %1466 = vpow2.f32 %v934_v9  ;;  %v2164_v9 = vld [vmem:[#allocation11 + $0xc8] sm:$0xff] (!%p1343_p2) }
 0x2a0   : > { %v941_v2 = vadd.f32 %v1445_v0, %v940_v63  ;;  %v1449_v6 = vpop.eup %1448  ;;  %1468 = vpow2.f32 %v936_v19  ;;  %v1015_v63 = vld [vmem:[#allocation11 + $0x58] sm:$0xff] (!%p1343_p2)  ;;  %v2132_v0 = vld [vmem:[#allocation11 + $0x60] sm:$0xff] (!%p1343_p2) }
 0x2a1   : > { %v1451_v10 = vpop.eup %1450  ;;  %1470 = vpow2.f32 %v938_v24  ;;  %v2172_v24 = vld [vmem:[#allocation11 + $0xd8] sm:$0xff] (!%p1343_p2) }
 0x2a2   : > { %v942_v4 = vadd.f32 %v1447_v53, %v941_v2  ;;  %v1453_v12 = vpop.eup %1452  ;;  %1472 = vpow2.f32 %v884_v46  ;;  %v2138_v2 = vld [vmem:[#allocation11 + $0x78] sm:$0xff] (!%p1343_p2)  ;;  %v2140_v53 = vld [vmem:[#allocation11 + $0x80] sm:$0xff] (!%p1343_p2) }
 0x2a3   : > { %v1455_v18 = vpop.eup %1454  ;;  %v2200_v46 = vld [vmem:[#allocation11 + $0x118] sm:$0xff] (!%p1343_p2) }
 0x2a4   : > { %v943_v8 = vadd.f32 %v1449_v6, %v942_v4  ;;  %v1457_v14 = vpop.eup %1456  ;;  %v2146_v4 = vld [vmem:[#allocation11 + $0x98] sm:$0xff] (!%p1343_p2) }
 0x2a5   : > { %v1459_v27 = vpop.eup %1458 }
 0x2a6   : > { %v944_v5 = vadd.f32 %v1451_v10, %v943_v8  ;;  %v1461_v28 = vpop.eup %1460  ;;  %v2154_v8 = vld [vmem:[#allocation11 + $0xb0] sm:$0xff] (!%p1343_p2)  ;;  %v2156_v10 = vld [vmem:[#allocation11 + $0xb8] sm:$0xff] (!%p1343_p2) }
 0x2a7   : > { %v1463_v30 = vpop.eup %1462 }
 0x2a8   : > { %v945_v17 = vadd.f32 %v1453_v12, %v944_v5  ;;  %v1465_v22 = vpop.eup %1464 }
 0x2a9   : > { %v1467_v33 = vpop.eup %1466 }
 0x2aa   : > { %v946_v23 = vadd.f32 %v1455_v18, %v945_v17  ;;  %v1469_v37 = vpop.eup %1468  ;;  %v2166_v17 = vld [vmem:[#allocation11 + $0xd0] sm:$0xff] (!%p1343_p2) }
 0x2ab   : > { %v1471_v43 = vpop.eup %1470 }
 0x2ac   : > { %v947_v25 = vadd.f32 %v1457_v14, %v946_v23  ;;  %v1473_v47 = vpop.eup %1472 }
 0x2ad   : > { %v886_v49 = vmul.f32 %v1473_v47, %v882_v48 }
 0x2ae   : > { %v948_v13 = vadd.f32 %v1459_v27, %v947_v25  ;;  %v2174_v25 = vld [vmem:[#allocation11 + $0xe0] sm:$0xff] (!%p1343_p2)  ;;  %v2176_v27 = vld [vmem:[#allocation11 + $0xe8] sm:$0xff] (!%p1343_p2) }
 0x2b0   : > { %v949_v29 = vadd.f32 %v1461_v28, %v948_v13 }
 0x2b2   : > { %v950_v31 = vadd.f32 %v1463_v30, %v949_v29 }
 0x2b4   : > { %v951_v32 = vadd.f32 %v1465_v22, %v950_v31  ;;  %v2182_v31 = vld [vmem:[#allocation11 + $0xf0] sm:$0xff] (!%p1343_p2)  ;;  %v2184_v22 = vld [vmem:[#allocation11 + $0xf8] sm:$0xff] (!%p1343_p2) }
 0x2b6   : > { %v952_v34 = vadd.f32 %v1467_v33, %v951_v32  ;;  %v2186_v32 = vld [vmem:[#allocation11 + $0x100] sm:$0xff] (!%p1343_p2) }
 0x2b8   : > { %v953_v42 = vadd.f32 %v1469_v37, %v952_v34 }
 0x2ba   : > { %v954_v45 = vadd.f32 %v1471_v43, %v953_v42  ;;  %v2196_v43 = vld [vmem:[#allocation11 + $0x108] sm:$0xff] (!%p1343_p2) }
 0x2bc   : > { %955 = vadd.xlane.f32.xlu1 %v954_v45  ;;  %v2198_v45 = vld [vmem:[#allocation11 + $0x110] sm:$0xff] (!%p1343_p2) }
 0x346   : > { %998 = sbr.rel (%p1343_p2) target bundleno = 1022 (0x3fe), region = 52 }
 0x349   : > { %v956_v50 = vpop.xlane.xlu1 %955 }
 0x34a   : > { %v957_v51 = vadd.f32 %v956_v50, %v886_v49 }
 0x34c   : > { %959 = vst.msk [vmem:[#allocation3] sm:$0xff] %vm958_vm2, %v957_v51  ;;  %v2210_v51 = vld [vmem:[#allocation11 + $0x120] sm:$0xff] (!%p1343_p2) }
 0x353   : > { %v1000_v52 = vld [vmem:[#allocation3] sm:$0xff] }
 0x354   : > { %1475 = vlog2.f32 %v1000_v52  ;;  %v2212_v52 = vld [vmem:[#allocation11 + $0x128] sm:$0xff] }
 0x35e   : > { %v1476_v55 = vpop.eup %1475 }
 0x35f   : > { %v1002_v21 = vmul.f32 0.6931472, %v1476_v55 }
 0x361   : > { %v1003_v35 = vadd.f32 %v1002_v21, %v999_v16 }
 0x363   : > { %1054 = vperm.xlu0 %1474, %v1003_v35  }
 0x3e2   : > { %v2148_v6 = vpop.permute.xlu0 %1054 }
 0x3e3   : > { %v1057_v11 = vsub.f32 %v1004_v38, %v2148_v6  ;;  %v1058_v60 = vsub.f32 %v1005_v41, %v2148_v6  ;;  %v1059_v5 = vsub.f32 %v1006_v20, %v2148_v6  ;;  %v1060_v12 = vsub.f32 %v1007_v26, %v2148_v6  ;;  %v1043_v38 = vld [vmem:[#allocation11 + $0x138] sm:$0xff]  ;;  %v1044_v41 = vld [vmem:[#allocation11 + $0x140] sm:$0xff]  ;;  %v1045_v20 = vld [vmem:[#allocation11 + $0x148] sm:$0xff] }
 0x3e4   : > { %v1061_v18 = vsub.f32 %v1008_v58, %v2148_v6  ;;  %v1062_v19 = vsub.f32 %v1009_v36, %v2148_v6  ;;  %v1063_v23 = vsub.f32 %v1010_v59, %v2148_v6  ;;  %v1064_v14 = vsub.f32 %v1011_v61, %v2148_v6  ;;  %v1046_v61 = vld [vmem:[#allocation11 + $0x150] sm:$0xff] }
 0x3e5   : > { %v1065_v13 = vsub.f32 %v1012_v40, %v2148_v6  ;;  %v1066_v28 = vsub.f32 %v1013_v62, %v2148_v6  ;;  %v1067_v29 = vsub.f32 %v1014_v39, %v2148_v6  ;;  %v1068_v30 = vsub.f32 %v1015_v63, %v2148_v6  ;;  %1105 = vst [vmem:[#allocation11] sm:$0xff] %v1057_v11  ;;  %v1047_v40 = vld [vmem:[#allocation11 + $0x158] sm:$0xff]  ;;  %v1048_v62 = vld [vmem:[#allocation11 + $0x160] sm:$0xff] }
 0x3e6   : > { %1106 = vst [vmem:[#allocation11 + $0x8] sm:$0xff] %v1058_v60  ;;  %1107 = vst [vmem:[#allocation11 + $0x10] sm:$0xff] %v1059_v5  ;;  %v1069_v33 = vsub.f32 %v2132_v0, %v2148_v6  ;;  %v1070_v34 = vsub.f32 %v2134_v44, %v2148_v6  ;;  %v1071_v37 = vsub.f32 %v2136_v1, %v2148_v6  ;;  %v1049_v1 = vld [vmem:[#allocation11 + $0x168] sm:$0xff] }
 0x3e7   : > { %1108 = vst [vmem:[#allocation11 + $0x18] sm:$0xff] %v1060_v12  ;;  %v1072_v42 = vsub.f32 %v2138_v2, %v2148_v6  ;;  %1109 = vst [vmem:[#allocation11 + $0x20] sm:$0xff] %v1061_v18  ;;  %v1073_v47 = vsub.f32 %v2140_v53, %v2148_v6  ;;  %v1074_v48 = vsub.f32 %v2142_v3, %v2148_v6  ;;  %v1050_v2 = vld [vmem:[#allocation11 + $0x170] sm:$0xff]  ;;  %v1051_v53 = vld [vmem:[#allocation11 + $0x178] sm:$0xff] }
 0x3e8   : > { %1110 = vst [vmem:[#allocation11 + $0x28] sm:$0xff] %v1062_v19  ;;  %1111 = vst [vmem:[#allocation11 + $0x30] sm:$0xff] %v1063_v23  ;;  %v1075_v49 = vsub.f32 %v2144_v57, %v2148_v6  ;;  %v1076_v50 = vsub.f32 %v2146_v4, %v2148_v6  ;;  %v1077_v55 = vsub.f32 %v2150_v7, %v2148_v6 }
 0x3e9   : > { %1112 = vst [vmem:[#allocation11 + $0x38] sm:$0xff] %v1064_v14  ;;  %1113 = vst [vmem:[#allocation11 + $0x40] sm:$0xff] %v1065_v13  ;;  %v1078_v16 = vsub.f32 %v2152_v56, %v2148_v6  ;;  %v1079_v21 = vsub.f32 %v2154_v8, %v2148_v6  ;;  %v1080_v35 = vsub.f32 %v2156_v10, %v2148_v6 }
 0x3ea   : > { %1114 = vst [vmem:[#allocation11 + $0x48] sm:$0xff] %v1066_v28  ;;  %1115 = vst [vmem:[#allocation11 + $0x50] sm:$0xff] %v1067_v29  ;;  %v1081_v26 = vsub.f32 %v2162_v15, %v2148_v6  ;;  %v1082_v58 = vsub.f32 %v2164_v9, %v2148_v6  ;;  %v1083_v36 = vsub.f32 %v2166_v17, %v2148_v6 }
 0x3eb   : > { %1116 = vst [vmem:[#allocation11 + $0x58] sm:$0xff] %v1068_v30  ;;  %1117 = vst [vmem:[#allocation11 + $0x60] sm:$0xff] %v1069_v33  ;;  %v1084_v59 = vsub.f32 %v2172_v24, %v2148_v6  ;;  %v1085_v39 = vsub.f32 %v2174_v25, %v2148_v6  ;;  %v1086_v63 = vsub.f32 %v2176_v27, %v2148_v6 }
 0x3ec   : > { %1118 = vst [vmem:[#allocation11 + $0x68] sm:$0xff] %v1070_v34  ;;  %1119 = vst [vmem:[#allocation11 + $0x70] sm:$0xff] %v1071_v37  ;;  %v1087_v0 = vsub.f32 %v2182_v31, %v2148_v6  ;;  %v1088_v44 = vsub.f32 %v2184_v22, %v2148_v6  ;;  %v1089_v3 = vsub.f32 %v2186_v32, %v2148_v6 }
 0x3ed   : > { %1120 = vst [vmem:[#allocation11 + $0x78] sm:$0xff] %v1072_v42  ;;  %1121 = vst [vmem:[#allocation11 + $0x80] sm:$0xff] %v1073_v47  ;;  %v1090_v57 = vsub.f32 %v2196_v43, %v2148_v6  ;;  %v1091_v4 = vsub.f32 %v2198_v45, %v2148_v6  ;;  %v1092_v7 = vsub.f32 %v2200_v46, %v2148_v6 }
 0x3ee   : > { %1122 = vst [vmem:[#allocation11 + $0x88] sm:$0xff] %v1074_v48  ;;  %1123 = vst [vmem:[#allocation11 + $0x90] sm:$0xff] %v1075_v49  ;;  %v1093_v56 = vsub.f32 %v2210_v51, %v2148_v6  ;;  %v1094_v8 = vsub.f32 %v2212_v52, %v2148_v6  ;;  %v1095_v10 = vsub.f32 %v2214_v54, %v2148_v6 }
 0x3ef   : > { %1124 = vst [vmem:[#allocation11 + $0x98] sm:$0xff] %v1076_v50  ;;  %1125 = vst [vmem:[#allocation11 + $0xa0] sm:$0xff] %v1077_v55  ;;  %v1096_v11 = vsub.f32 %v1043_v38, %v2148_v6  ;;  %v1097_v60 = vsub.f32 %v1044_v41, %v2148_v6  ;;  %v1098_v5 = vsub.f32 %v1045_v20, %v2148_v6 }
 0x3f0   : > { %1126 = vst [vmem:[#allocation11 + $0xa8] sm:$0xff] %v1078_v16  ;;  %1127 = vst [vmem:[#allocation11 + $0xb0] sm:$0xff] %v1079_v21  ;;  %v1099_v12 = vsub.f32 %v1046_v61, %v2148_v6  ;;  %v1100_v15 = vsub.f32 %v1047_v40, %v2148_v6  ;;  %v1101_v9 = vsub.f32 %v1048_v62, %v2148_v6 }
 0x3f1   : > { %1128 = vst [vmem:[#allocation11 + $0xb8] sm:$0xff] %v1080_v35  ;;  %1129 = vst [vmem:[#allocation11 + $0xc0] sm:$0xff] %v1081_v26  ;;  %v1102_v17 = vsub.f32 %v1049_v1, %v2148_v6  ;;  %v1103_v18 = vsub.f32 %v1050_v2, %v2148_v6  ;;  %v1104_v19 = vsub.f32 %v1051_v53, %v2148_v6 }
 0x3f2   : > { %1130 = vst [vmem:[#allocation11 + $0xc8] sm:$0xff] %v1082_v58  ;;  %1131 = vst [vmem:[#allocation11 + $0xd0] sm:$0xff] %v1083_v36 }
 0x3f3   : > { %1132 = vst [vmem:[#allocation11 + $0xd8] sm:$0xff] %v1084_v59  ;;  %1133 = vst [vmem:[#allocation11 + $0xe0] sm:$0xff] %v1085_v39 }
 0x3f4   : > { %1134 = vst [vmem:[#allocation11 + $0xe8] sm:$0xff] %v1086_v63  ;;  %1135 = vst [vmem:[#allocation11 + $0xf0] sm:$0xff] %v1087_v0 }
 0x3f5   : > { %1136 = vst [vmem:[#allocation11 + $0xf8] sm:$0xff] %v1088_v44  ;;  %1137 = vst [vmem:[#allocation11 + $0x100] sm:$0xff] %v1089_v3 }
 0x3f6   : > { %1138 = vst [vmem:[#allocation11 + $0x108] sm:$0xff] %v1090_v57  ;;  %1139 = vst [vmem:[#allocation11 + $0x110] sm:$0xff] %v1091_v4 }
 0x3f7   : > { %1140 = vst [vmem:[#allocation11 + $0x118] sm:$0xff] %v1092_v7  ;;  %1141 = vst [vmem:[#allocation11 + $0x120] sm:$0xff] %v1093_v56 }
 0x3f8   : > { %1142 = vst [vmem:[#allocation11 + $0x128] sm:$0xff] %v1094_v8  ;;  %1143 = vst [vmem:[#allocation11 + $0x130] sm:$0xff] %v1095_v10 }
 0x3f9   : > { %1144 = vst [vmem:[#allocation11 + $0x138] sm:$0xff] %v1096_v11  ;;  %1145 = vst [vmem:[#allocation11 + $0x140] sm:$0xff] %v1097_v60 }
 0x3fa   : > { %1146 = vst [vmem:[#allocation11 + $0x148] sm:$0xff] %v1098_v5  ;;  %1147 = vst [vmem:[#allocation11 + $0x150] sm:$0xff] %v1099_v12 }
 0x3fb   : > { %1148 = vst [vmem:[#allocation11 + $0x158] sm:$0xff] %v1100_v15  ;;  %1149 = vst [vmem:[#allocation11 + $0x160] sm:$0xff] %v1101_v9 }
 0x3fc   : > { %1150 = vst [vmem:[#allocation11 + $0x168] sm:$0xff] %v1102_v17  ;;  %1151 = vst [vmem:[#allocation11 + $0x170] sm:$0xff] %v1103_v18 }
 0x3fd   : > { %1152 = vst [vmem:[#allocation11 + $0x178] sm:$0xff] %v1104_v19 }
 0x3fe PF: > { %s1353_s11 = sshll.u32 %s1731_s19, 11  ;;  %s1168_s8 = sshll.u32 %s1896_s20, 4  ;;  %s1169_s8 = int_to_ptr.vmem [resolvable:$true] %s1168_s8 }
 0x3ff   : > { %s2267_s6 = scalar_lea.hbm %s2330_s3, %s1353_s11  ;;  %s1154_s22 = scalar_lea.sflag [#allocation6], %s1882_s30 }
 0x400   : > { %s1563_s23 = scalar_lea.vmem %s1169_s8, 2048  ;;  %p2355_p1 = scmp.ne.s32.totalorder %s2340_s27, 0 }
 0x401   : > { %p1564_p7 = scmp.ne.s32.totalorder %s1169_s8, %s1563_s23  ;;  %s1681_s9 = smov [#allocation10]  }
 0x402   : > { %s1567_s12 = sshll.u32 %s1681_s9, 4  ;;  %s1568_s12 = int_to_ptr.vmem [resolvable:$false] %s1567_s12 }
 0x403   : > { %p1565_p0 = pnand %p1564_p7, %p2355_p1  ;;  %s1569_s10 = scalar_lea.vmem %s1568_s12, 4096 }
 0x404   : > { %p1570_p11 = scmp.lt.s32.totalorder %s1169_s8, %s1568_s12  ;;  %p1571_p12 = scmp.lt.s32.totalorder %s1569_s10, %s1563_s23 }
 0x405   : > { %p1566_p5 = pneg %p1565_p0 }
 0x406   : > { %p1572_p4 = por %p1571_p12, %p1570_p11 }
 0x408   : > { %p1573_p6 = pnand %p1572_p4, %p1566_p5 }
 0x40a   : > { %1576 = shalt.err (!%p1573_p6)
}
 0x40b   : > { %s1577_s30 = scalar_lea.hbm %s2267_s6, 2048  ;;  %s1581_s26 = scalar_lea.hbm %s2330_s3, 6144 }
 0x40c   : > { %p1578_p13 = scmp.ne.s32.totalorder %s2267_s6, %s1577_s30  ;;  %p1582_p8 = scmp.lt.u32.totalorder %s2267_s6, %s2330_s3 }
 0x40d   : > { %p1583_p10 = scmp.lt.u32.totalorder %s1581_s26, %s1577_s30  ;;  %p1585_p7 = scmp.lt.u32.totalorder %s1577_s30, %s2267_s6 }
 0x40e   : > { %p1579_p9 = pnand %p1578_p13, %p2355_p1 }
 0x40f   : > { %p1584_p2 = por %p1583_p10, %p1582_p8 }
 0x410   : > { %p1580_p3 = pneg %p1579_p9 }
 0x411   : > { %p1586_p0 = por %p1585_p7, %p1584_p2 }
 0x413   : > { %p1587_p5 = pnand %p1586_p0, %p1580_p3 }
 0x415   : > { %1590 = shalt.err (!%p1587_p5)
}
 0x416   : > { %1364 = dma.vmem_to_hbm [thread:$0]  (%p2355_p1), %s1169_s8, 2048, %s2267_s6, %s1154_s22  }
 0x417   : > { %s1682_s7 = smov [#allocation11]   ;;  %p2356_p12 = scmp.eq.s32.totalorder %s1731_s19, 2 }
 0x418   : > { %s1178_s11 = sshll.u32 %s1682_s7, 4  ;;  %s1179_s11 = int_to_ptr.vmem [resolvable:$true] %s1178_s11 }
 0x419   : > { %s1591_s13 = scalar_lea.vmem %s1179_s11, 6144  ;;  %p1598_p13 = scmp.lt.s32.totalorder %s1179_s11, %s1179_s11 }
 0x41a   : > { %p1592_p11 = scmp.ne.s32.totalorder %s1179_s11, %s1591_s13  ;;  %p1599_p9 = scmp.lt.s32.totalorder %s1591_s13, %s1591_s13 }
 0x41c   : > { %p1593_p4 = pnand %p1592_p11, %p2356_p12  ;;  %p1600_p8 = por %p1599_p9, %p1598_p13 }
 0x41e   : > { %p1594_p6 = pneg %p1593_p4 }
 0x420   : > { %p1601_p10 = pnand %p1600_p8, %p1594_p6 }
 0x422   : > { %1604 = shalt.err (!%p1601_p10)
}
 0x423   : > { %s1605_s27 = scalar_lea.hbm %s2331_s4, 6144  ;;  %p2357_p3 = pmov %p2356_p12 }
 0x424   : > { %p1606_p1 = scmp.ne.s32.totalorder %s2331_s4, %s1605_s27  ;;  %p1611_p0 = scmp.lt.u32.totalorder %s1605_s27, %s2331_s4 }
 0x426   : > { %p1607_p2 = pnand %p1606_p1, %p2357_p3 }
 0x428   : > { %p1608_p7 = pneg %p1607_p2 }
 0x42a   : > { %p1613_p5 = pnand %p1611_p0, %p1608_p7 }
 0x42c   : > { %1616 = shalt.err (!%p1613_p5)
}
 0x42d   : > { %s1683_s12 = smov 2048   ;;  %s1684_s10 = smov 128  }
 0x42e   : > { %p2358_p11 = pmov %p2357_p3  ;;  %p2359_p12 = pmov %p2357_p3 }
 0x430   : > { %1366 = dma.vmem_to_hbm [thread:$0]  (%p2358_p11), %s1179_s11, 6144, %s2331_s4, [#allocation12], %s1683_s12, %s1683_s12, %s1684_s10  }
 0x431   : > { %1646 = dma.done.wait (%p2359_p12), [#allocation12], 6144   ;;  %p2360_p4 = pmov %p2357_p3 }
 0x433   : > { %1648 = vsyncadd (%p2360_p4), [#allocation12], 4294961152 }
 0x434 PF: > { %p1392_p6 = scmp.ge.s32.totalorder %s1667_s18, 2  ;;  %s1197_s20 = sand.u32 1, %s1655_s15  }
 0x435   : > { %p2361_p13 = scmp.ne.s32.totalorder %s2341_s28, 0  ;;  %s1198_s26 = scalar_lea.sflag [#allocation6], %s1197_s20 }
 0x437   : > { %p1382_p9 = pnand %p1392_p6, %p2361_p13 }
 0x439   : > { %1650 = dma.done.wait (!%p1382_p9), %s1198_s26, 2048  }
 0x43a   : > { %1652 = vsyncadd (!%p1382_p9), %s1198_s26, 4294965248  ;;  %p20_p8 = scmp.ge.s32.totalorder %s1735_s21, 5   ;;  %s2362_s15 = smov %s1659_s16 }
 0x43b   : > { %s2363_s16 = smov %s1663_s17  ;;  %s2364_s17 = smov %s1747_s24 }
 0x43c   : > { %s2365_s18 = smov %s1735_s21  ;;  %22 = sbr.rel (!%p20_p8) target bundleno = 7 (0x7), region = 104 }
 0x443   :  { %1203 = vsyncpa [#allocation5], 1 }
 0x444   :  { %1205 = vsyncpa [#allocation5 + $0x1], 1 }
 0x445   :  { %1206 = vsyncpa [#allocation8], 1 }
 0x446   :  { %1208 = vsyncpa [#allocation8 + $0x1], 1 }
 0x447   :  { %1209 = vsyncpa [#allocation6], 1 }
 0x448   :  { %1211 = vsyncpa [#allocation6 + $0x1], 1 }
 0x449   :  { %1212 = vsyncpa [#allocation12], 1 }

</bundles_post_ra>
